<compile_context>
chip_gen: v7x
topology: tpu7x:2x2x1
jax: 0.10.0
libtpu: 0.0.40
codegen_flags: <defaults>
</compile_context>

<pallas_src>
import jax
import jax.numpy as jnp
from jax.experimental import pallas as pl
from jax.experimental.pallas import tpu as pltpu


def mlp_kernel(x_ref, w1_ref, b1_ref, w2_ref, b2_ref, out_ref):
    # x_ref:  (TB, F_in_pad)      f32
    # w1_ref: (F_in_pad, H_pad)   bf16   (resident across the grid)
    # b1_ref: (1, H_pad)          f32
    # w2_ref: (H_pad, F_out_pad)  bf16
    # b2_ref: (1, F_out_pad)      f32   (padded lanes pre-set to -1e30)
    # out_ref:(TB, F_out_pad)     f32
    x = x_ref[...]

    # Hidden layer: Linear -> Dropout(identity at inference) -> ReLU.
    # TODO(synk): training-mode dropout (random mask + 1/(1-p) scale) not
    #             implemented; this matches model.eval() semantics.
    h = jnp.dot(x.astype(jnp.bfloat16), w1_ref[...],
                preferred_element_type=jnp.float32) + b1_ref[...]
    h = jnp.maximum(h, 0.0)

    # Classifier layer. Padded output columns get bias -1e30 -> exp underflows
    # to 0 below, so no in-kernel mask is needed (every row always has at
    # least one real, finite logit, so max/exp never see an all -1e30 row).
    logits = jnp.dot(h.astype(jnp.bfloat16), w2_ref[...],
                     preferred_element_type=jnp.float32) + b2_ref[...]

    # Numerically stable softmax over dim=1; exact division (denominator is a
    # (TB,1) column, so exactness is essentially free and keeps row sums == 1).
    m = jnp.max(logits, axis=1, keepdims=True)
    e = jnp.exp(logits - m)
    denom = jnp.sum(e, axis=1, keepdims=True)
    out_ref[...] = (e / denom).astype(out_ref.dtype)


def prepare_params(w1, b1, w2, b2, *, lane=128):
    """One-time parameter prep: lane-pad feature dims and cast weights to bf16.

    Call once (e.g. at init); reusing the result avoids re-padding / re-casting
    the weight matrices on every forward call.
    """
    f_in, h = w1.shape
    f_out = w2.shape[1]
    fp = pl.cdiv(f_in, lane) * lane
    hp = pl.cdiv(h, lane) * lane
    fop = pl.cdiv(f_out, lane) * lane

    w1p = jnp.pad(w1, ((0, fp - f_in), (0, hp - h))).astype(jnp.bfloat16)
    b1p = jnp.pad(b1, ((0, 0), (0, hp - h)))
    w2p = jnp.pad(w2, ((0, hp - h), (0, fop - f_out))).astype(jnp.bfloat16)
    # Bake the softmax padding mask into b2: padded logit columns become a
    # huge negative constant so exp() underflows to exactly 0 in the kernel.
    b2p = jnp.pad(b2, ((0, 0), (0, fop - f_out)), constant_values=-1e30)

    return {"w1": w1p, "b1": b1p, "w2": w2p, "b2": b2p,
            "n_in": f_in, "n_out": f_out}


def _pick_batch_tile(bp, block_b):
    """bp is a multiple of 8. Pick the largest tile <= block_b dividing bp,
    keeping >= 2 grid steps when possible so both v7x TensorCores get work."""
    tb = max(8, (min(block_b, bp) // 8) * 8)
    while bp % tb != 0:
        tb -= 8
    if bp // tb < 2 and bp >= 16 and bp % 16 == 0:
        tb = bp // 2
    return tb


def _vmem_limit_bytes(tb, fp, hp, fop):
    """Budget = double-buffered x/out tiles + (double-buffered) resident
    weights/biases + headroom; capped at 64 MiB (safe on v7x and below)."""
    x_tile = tb * fp * 4
    out_tile = tb * fop * 4
    weights = (fp * hp + hp * fop) * 2 + (hp + fop) * 4
    need = 2 * (x_tile + out_tile) + 2 * weights
    need = int(need * 1.5) + (4 << 20)
    return min(max(need, 16 << 20), 64 << 20)


def mlp_forward(x, params, *, block_b=512):
    """x: (B, F_in) f32; params: output of prepare_params()."""
    B, f_in = x.shape
    w1p, b1p, w2p, b2p = params["w1"], params["b1"], params["w2"], params["b2"]
    assert f_in == params["n_in"]
    fp, hp = w1p.shape
    fop = w2p.shape[1]
    f_out = params["n_out"]

    # Batch: pad only to a sublane multiple (8), not up to block_b.
    bp = pl.cdiv(B, 8) * 8
    xp = jnp.pad(x, ((0, bp - B), (0, fp - f_in)))

    tb = _pick_batch_tile(bp, block_b)
    grid = (bp // tb,)

    out = pl.pallas_call(
        mlp_kernel,
        out_shape=jax.ShapeDtypeStruct((bp, fop), jnp.float32),
        grid=grid,
        in_specs=[
            pl.BlockSpec((tb, fp), lambda i: (i, 0)),    # x: tiled over batch
            pl.BlockSpec((fp, hp), lambda i: (0, 0)),    # W1: VMEM-resident
            pl.BlockSpec((1, hp), lambda i: (0, 0)),     # b1: resident
            pl.BlockSpec((hp, fop), lambda i: (0, 0)),   # W2: resident
            pl.BlockSpec((1, fop), lambda i: (0, 0)),    # b2: resident
        ],
        out_specs=pl.BlockSpec((tb, fop), lambda i: (i, 0)),
        compiler_params=pltpu.CompilerParams(
            dimension_semantics=("parallel",),   # shards batch over v7x's 2 TCs
            vmem_limit_bytes=_vmem_limit_bytes(tb, fp, hp, fop),
        ),
    )(xp, w1p, b1p, w2p, b2p)

    return out[:B, :f_out]


def init_params(key, in_features, hidden, out_features):
    """Deterministic init (uniform, PyTorch default scale), stored as (in, out)."""
    k1, k2, k3, k4 = jax.random.split(key, 4)
    lim1 = 1.0 / jnp.sqrt(in_features)
    lim2 = 1.0 / jnp.sqrt(hidden)
    w1 = jax.random.uniform(k1, (in_features, hidden), jnp.float32, -lim1, lim1)
    b1 = jax.random.uniform(k2, (1, hidden), jnp.float32, -lim1, lim1)
    w2 = jax.random.uniform(k3, (hidden, out_features), jnp.float32, -lim2, lim2)
    b2 = jax.random.uniform(k4, (1, out_features), jnp.float32, -lim2, lim2)
    return w1, b1, w2, b2


def mlp_reference(x, w1, b1, w2, b2):
    h = jnp.maximum(x @ w1 + b1, 0.0)
    logits = h @ w2 + b2
    return jax.nn.softmax(logits, axis=1)


if __name__ == "__main__":
    # Module defaults for features (100/100/100); batch sized so the padded
    # batch splits into >= 2 grid steps (exercises the tiled/parallel path).
    B, F_IN, H, F_OUT = 256, 100, 100, 100

    key = jax.random.PRNGKey(0)
    kx, kp = jax.random.split(key)
    x = jax.random.normal(kx, (B, F_IN), dtype=jnp.float32)
    w1, b1, w2, b2 = init_params(kp, F_IN, H, F_OUT)

    # One-time parameter prep (padding + bf16 cast happen here, not per call).
    params = prepare_params(w1, b1, w2, b2)

    y = mlp_forward(x, params)
    y = jax.block_until_ready(y)

    assert y.shape == (B, F_OUT)

    # Exact-division softmax: rows sum to 1 to f32 precision.
    row_sums = jnp.sum(y, axis=1)
    assert jnp.allclose(row_sums, jnp.ones((B,), jnp.float32), atol=1e-4)

    # Match the f32 reference forward within bf16-matmul tolerance.
    y_ref = mlp_reference(x, w1, b1, w2, b2)
    assert jnp.allclose(y, y_ref, atol=5e-3)

    print("KERNEL_OK")
</pallas_src>

<mosaic_0001>
module attributes {stable_mosaic.version = 11 : i64} {
  func.func @mlp_kernel(%arg0: i32, %arg1: memref<128x128xf32, #tpu.memory_space<vmem>>, %arg2: memref<128x128xbf16, #tpu.memory_space<vmem>>, %arg3: memref<1x128xf32, #tpu.memory_space<vmem>>, %arg4: memref<128x128xbf16, #tpu.memory_space<vmem>>, %arg5: memref<1x128xf32, #tpu.memory_space<vmem>>, %arg6: memref<128x128xf32, #tpu.memory_space<vmem>>) attributes {dimension_semantics = [#tpu.dimension_semantics<parallel>], iteration_bounds = array<i64: 2>, scalar_prefetch = 0 : i64, scratch_operands = 0 : i64, tpu.core_type = #tpu.core_type<tc>, window_params = [{transform_indices = @transform_0, window_bounds = array<i64: 128, 128>}, {pipeline_mode = #tpu.pipeline_mode<synchronous>, transform_indices = @transform_1, window_bounds = array<i64: 128, 128>}, {pipeline_mode = #tpu.pipeline_mode<synchronous>, transform_indices = @transform_2, window_bounds = array<i64: 1, 128>}, {pipeline_mode = #tpu.pipeline_mode<synchronous>, transform_indices = @transform_3, window_bounds = array<i64: 128, 128>}, {pipeline_mode = #tpu.pipeline_mode<synchronous>, transform_indices = @transform_4, window_bounds = array<i64: 1, 128>}, {transform_indices = @transform_5, window_bounds = array<i64: 128, 128>}]} {
    %c0 = arith.constant 0 : index
    %c0_0 = arith.constant 0 : index
    %0 = vector.load %arg1[%c0, %c0_0] : memref<128x128xf32, #tpu.memory_space<vmem>>, vector<128x128xf32>
    %1 = arith.truncf %0 : vector<128x128xf32> to vector<128x128xbf16>
    %c0_1 = arith.constant 0 : index
    %c0_2 = arith.constant 0 : index
    %2 = vector.load %arg2[%c0_1, %c0_2] : memref<128x128xbf16, #tpu.memory_space<vmem>>, vector<128x128xbf16>
    %cst = arith.constant dense<0.000000e+00> : vector<128x128xf32>
    %3 = tpu.matmul %1, %2, %cst {dimension_numbers = #tpu.dot_dimension_numbers<[1], [0], [0], [1], [0, 0, 1, 1], [], []>} : vector<128x128xbf16>, vector<128x128xbf16>, vector<128x128xf32> -> vector<128x128xf32>
    %c0_3 = arith.constant 0 : index
    %c0_4 = arith.constant 0 : index
    %4 = vector.load %arg3[%c0_3, %c0_4] : memref<1x128xf32, #tpu.memory_space<vmem>>, vector<1x128xf32>
    %5 = vector.broadcast %4 : vector<1x128xf32> to vector<128x128xf32>
    %6 = arith.addf %3, %5 : vector<128x128xf32>
    %cst_5 = arith.constant 0.000000e+00 : f32
    %7 = vector.broadcast %cst_5 : f32 to vector<128x128xf32>
    %8 = arith.maximumf %6, %7 : vector<128x128xf32>
    %9 = arith.truncf %8 : vector<128x128xf32> to vector<128x128xbf16>
    %c0_6 = arith.constant 0 : index
    %c0_7 = arith.constant 0 : index
    %10 = vector.load %arg4[%c0_6, %c0_7] : memref<128x128xbf16, #tpu.memory_space<vmem>>, vector<128x128xbf16>
    %cst_8 = arith.constant dense<0.000000e+00> : vector<128x128xf32>
    %11 = tpu.matmul %9, %10, %cst_8 {dimension_numbers = #tpu.dot_dimension_numbers<[1], [0], [0], [1], [0, 0, 1, 1], [], []>} : vector<128x128xbf16>, vector<128x128xbf16>, vector<128x128xf32> -> vector<128x128xf32>
    %c0_9 = arith.constant 0 : index
    %c0_10 = arith.constant 0 : index
    %12 = vector.load %arg5[%c0_9, %c0_10] : memref<1x128xf32, #tpu.memory_space<vmem>>, vector<1x128xf32>
    %13 = vector.broadcast %12 : vector<1x128xf32> to vector<128x128xf32>
    %14 = arith.addf %11, %13 : vector<128x128xf32>
    %cst_11 = arith.constant dense<0xFF800000> : vector<128xf32>
    %15 = vector.multi_reduction <maximumf>, %14, %cst_11 [1] : vector<128x128xf32> to vector<128xf32>
    %16 = vector.shape_cast %15 : vector<128xf32> to vector<128x1xf32>
    %17 = vector.broadcast %16 : vector<128x1xf32> to vector<128x128xf32>
    %18 = arith.subf %14, %17 : vector<128x128xf32>
    %19 = math.exp %18 : vector<128x128xf32>
    %cst_12 = arith.constant dense<0.000000e+00> : vector<128xf32>
    %20 = vector.multi_reduction <add>, %19, %cst_12 [1] : vector<128x128xf32> to vector<128xf32>
    %21 = vector.shape_cast %20 : vector<128xf32> to vector<128x1xf32>
    %22 = vector.broadcast %21 : vector<128x1xf32> to vector<128x128xf32>
    %23 = arith.divf %19, %22 : vector<128x128xf32>
    %c0_13 = arith.constant 0 : index
    %c0_14 = arith.constant 0 : index
    %24 = vector.load %arg6[%c0_13, %c0_14] : memref<128x128xf32, #tpu.memory_space<vmem>>, vector<128x128xf32>
    tpu.vector_store %arg6[%c0_13, %c0_14], %23 {strides = array<i32>} : memref<128x128xf32, #tpu.memory_space<vmem>>, vector<128x128xf32>,
    return
  }
  func.func @transform_0(%arg0: i32) -> (i32, i32) {
    %c0_i32 = arith.constant 0 : i32
    %c0_i32_0 = arith.constant 0 : i32
    return %arg0, %c0_i32 : i32, i32
  }
  func.func @transform_1(%arg0: i32) -> (i32, i32) {
    %c0_i32 = arith.constant 0 : i32
    %c0_i32_0 = arith.constant 0 : i32
    %c0_i32_1 = arith.constant 0 : i32
    return %c0_i32, %c0_i32_0 : i32, i32
  }
  func.func @transform_2(%arg0: i32) -> (i32, i32) {
    %c0_i32 = arith.constant 0 : i32
    %c0_i32_0 = arith.constant 0 : i32
    %c0_i32_1 = arith.constant 0 : i32
    return %c0_i32, %c0_i32_0 : i32, i32
  }
  func.func @transform_3(%arg0: i32) -> (i32, i32) {
    %c0_i32 = arith.constant 0 : i32
    %c0_i32_0 = arith.constant 0 : i32
    %c0_i32_1 = arith.constant 0 : i32
    return %c0_i32, %c0_i32_0 : i32, i32
  }
  func.func @transform_4(%arg0: i32) -> (i32, i32) {
    %c0_i32 = arith.constant 0 : i32
    %c0_i32_0 = arith.constant 0 : i32
    %c0_i32_1 = arith.constant 0 : i32
    return %c0_i32, %c0_i32_0 : i32, i32
  }
  func.func @transform_5(%arg0: i32) -> (i32, i32) {
    %c0_i32 = arith.constant 0 : i32
    %c0_i32_0 = arith.constant 0 : i32
    return %arg0, %c0_i32 : i32, i32
  }
}

</mosaic_0001>

<bundles_post_ra>
// kernel: tpu_custom_call.1
= control target key start
LH: loop header
LB: loop body
LE: loop exit
PB: predicated region body
PF: predicated region fallthrough
CT: control target
= control target key end

     0   :  { %10 = vsyncpa [#allocation3], 0  ;;  %s1787_s0 = inlined_call_operand.hbm [shape: f32[256,128], index: 0, kind: input, shape index: {}]   ;;  %s1788_s1 = inlined_call_operand.hbm [shape: bf16[128,128], index: 1, kind: input, shape index: {}]   ;;  %s1789_s2 = inlined_call_operand.vmem [shape: f32[1,128], index: 2, kind: input, shape index: {}]   ;;  %s1790_s3 = inlined_call_operand.hbm [shape: bf16[128,128], index: 3, kind: input, shape index: {}]   ;;  %s1791_s4 = inlined_call_operand.vmem [shape: f32[1,128], index: 4, kind: input, shape index: {}]   ;;  %s1792_s5 = inlined_call_operand.hbm [shape: f32[256,128], index: 5, kind: output, shape index: {}]  }
   0x1   :  { %12 = vsyncpa [#allocation3 + $0x1], 0 }
   0x2   :  { %13 = vsyncpa [#allocation6], 0 }
   0x3   :  { %14 = vsyncpa [#allocation4], 0 }
   0x4   :  { %16 = vsyncpa [#allocation4 + $0x1], 0  ;;  %s1410_s18 = smov 0   ;;  %s1412_s19 = smov 0  }
   0x5   :  { %s1414_s20 = smov 0   ;;  %s1416_s21 = smov 0  }
   0x6 LB: > { %s1431_s22 = sadd.s32 4294967295, %s1368_s21   ;;  %s925_s23 = sadd.s32 4294967294, %s1368_s21   ;;  %s1368_s21 = sphi %s1416_s21, %s1812_s21   ;;  %s1364_s20 = sphi %s1414_s20, %s1811_s20   ;;  %s1360_s19 = sphi %s1412_s19, %s1810_s19   ;;  %s1356_s18 = sphi %s1410_s18, %s1809_s18  }
   0x7   : > { %p42_p0 = scmp.ne.s32.totalorder %s1360_s19, %s1356_s18  ;;  %p1793_p1 = scmp.eq.s32.totalorder %s1431_s22, 0 }
   0x8   : > { %p156_p3 = scmp.eq.s32.totalorder %s925_s23, 1  ;;  %p926_p5 = scmp.ge.s32.totalorder %s1368_s21, 1 }
   0x9   : > { %p1440_p4 = por %p1793_p1, %p42_p0  ;;  %p163_p7 = scmp.lt.s32.totalorder %s1368_s21, 3 }
   0xa   : > { %p1445_p6 = por %p156_p3, %p42_p0  ;;  %s1370_s27 = smov [#allocation5]  }
   0xb   : > { %s1796_s24 = scalar_select %p1440_p4, 1, 0 }
   0xc   : > { %s1797_s25 = scalar_select %p1445_p6, 1, 0 }
   0xd   : > { %p1450_p8 = pnand %p926_p5, %p163_p7  ;;  %s175_s28 = sshll.u32 %s1370_s27, 4  ;;  %s1454_s28 = int_to_ptr.vmem [resolvable:$true] %s175_s28 }
   0xe   : > { %s1371_s30 = smov [#allocation7]   ;;  %s1212_s9 = scalar_lea.hbm %s1788_s1, 1024 }
   0xf   : > { %p1071_p9 = pneg %p1450_p8  ;;  %s191_s6 = sshll.u32 %s1371_s30, 4  ;;  %s1465_s6 = int_to_ptr.vmem [resolvable:$true] %s191_s6 }
  0x10   : > { %p1213_p12 = scmp.ne.s32.totalorder %s1788_s1, %s1212_s9  ;;  %p1219_p5 = scmp.lt.u32.totalorder %s1212_s9, %s1788_s1 }
  0x11   : > { %p1461_p11 = pnand %p1071_p9, %p1793_p1 }
  0x13   : > { %p1214_p13 = pneg %p1461_p11 }
  0x15   : > { %p1215_p0 = pnand %p1214_p13, %p1213_p12 }
  0x17   : > { %p1216_p3 = pneg %p1215_p0 }
  0x19   : > { %p1221_p7 = pnand %p1219_p5, %p1216_p3 }
  0x1b   : > { %1224 = shalt.err (!%p1221_p7)
}
  0x1c   : > { %s1225_s14 = scalar_lea.vmem %s1454_s28, 1024  ;;  %p1233_p2 = scmp.lt.s32.totalorder %s1454_s28, %s1454_s28 }
  0x1d   : > { %p1226_p9 = scmp.ne.s32.totalorder %s1454_s28, %s1225_s14  ;;  %p1234_p12 = scmp.lt.s32.totalorder %s1225_s14, %s1225_s14 }
  0x1f   : > { %p1228_p10 = pnand %p1226_p9, %p1214_p13  ;;  %p1235_p0 = por %p1234_p12, %p1233_p2 }
  0x21   : > { %p1229_p1 = pneg %p1228_p10 }
  0x23   : > { %p1236_p6 = pnand %p1235_p0, %p1229_p1 }
  0x25   : > { %1239 = shalt.err (!%p1236_p6)
}
  0x26   : > { %s1372_s15 = smov 64   ;;  %s1373_s16 = smov 4  }
  0x27   : > { %1074 = dma.hbm_to_vmem [thread:$0]  (!%p1461_p11), %s1788_s1, 1024, %s1454_s28, [#allocation6], %s1372_s15, %s1372_s15, %s1373_s16  }
  0x28   : > { %s1240_s7 = scalar_lea.hbm %s1790_s3, 1024 }
  0x29   : > { %p1241_p2 = scmp.ne.s32.totalorder %s1790_s3, %s1240_s7  ;;  %p1247_p10 = scmp.lt.u32.totalorder %s1240_s7, %s1790_s3 }
  0x2b   : > { %p1243_p1 = pnand %p1241_p2, %p1214_p13 }
  0x2d   : > { %p1244_p6 = pneg %p1243_p1 }
  0x2f   : > { %p1249_p3 = pnand %p1247_p10, %p1244_p6 }
  0x31   : > { %1252 = shalt.err (!%p1249_p3)
}
  0x32   : > { %s1253_s28 = scalar_lea.vmem %s1465_s6, 1024  ;;  %p1261_p12 = scmp.lt.s32.totalorder %s1465_s6, %s1465_s6 }
  0x33   : > { %p1254_p5 = scmp.ne.s32.totalorder %s1465_s6, %s1253_s28  ;;  %p1262_p0 = scmp.lt.s32.totalorder %s1253_s28, %s1253_s28 }
  0x35   : > { %p1256_p7 = pnand %p1254_p5, %p1214_p13  ;;  %p1263_p2 = por %p1262_p0, %p1261_p12 }
  0x37   : > { %p1257_p9 = pneg %p1256_p7 }
  0x39   : > { %p1264_p1 = pnand %p1263_p2, %p1257_p9 }
  0x3b   : > { %1267 = shalt.err (!%p1264_p1)
}
  0x3c   : > { %1077 = dma.hbm_to_vmem [thread:$0]  (!%p1461_p11), %s1790_s3, 1024, %s1465_s6, [#allocation6], %s1372_s15, %s1372_s15, %s1373_s16  }
  0x3d   : > { %s1520_s14 = sadd.s32 1, %s1368_s21   ;;  %s29_s29 = sadd.s32 1, %s1364_s20 }
  0x3e   : > { %s26_s17 = ssub.s32 %s1368_s21, %s1520_s14  ;;  %p36_p13 = scmp.ne.s32.totalorder %s1364_s20, %s1360_s19 }
  0x3f   : > { %p27_p6 = scmp.eq.s32.totalorder %s26_s17, 0  ;;  %p37_p10 = scmp.eq.s32.totalorder %s1368_s21, 0 }
  0x40   : > { %p1800_p3 = scmp.eq.s32.totalorder %s1431_s22, 1  ;;  %p1088_p7 = scmp.lt.s32.totalorder %s1368_s21, 2 }
  0x41   : > { %s1536_s27 = scalar_select %p27_p6, %s1364_s20, %s29_s29  }
  0x42   : > { %p1530_p5 = por %p1800_p3, %p36_p13  ;;  %p38_p9 = por %p37_p10, %p36_p13 }
  0x43   : > { %s208_s30 = sand.u32 1, %s1364_s20   ;;  %s961_s6 = sshll.u32 %s1368_s21, 11 }
  0x44   : > { %s1801_s23 = scalar_select %p1530_p5, 1, 0 }
  0x45   : > { %s930_s7 = sshll.u32 %s208_s30, 7  ;;  %s1543_s8 = scalar_lea.hbm %s1787_s0, %s961_s6 }
  0x46   : > { %s212_s9 = scalar_lea.vmem [#allocation2], %s930_s7  ;;  %p1547_p11 = pnand %p1088_p7, %p38_p9 }
  0x47   : > { %s219_s10 = sshll.u32 %s212_s9, 4  ;;  %s1551_s28 = scalar_lea.sflag [#allocation3], %s208_s30  ;;  %s1545_s10 = int_to_ptr.vmem [resolvable:$true] %s219_s10 }
  0x48   : > { %s1268_s12 = scalar_lea.hbm %s1543_s8, 2048  ;;  %p1270_p0 = pneg %p1547_p11 }
  0x49   : > { %p1269_p12 = scmp.ne.s32.totalorder %s1543_s8, %s1268_s12  ;;  %s1273_s17 = scalar_lea.hbm %s1787_s0, 4096 }
  0x4a   : > { %p1274_p13 = scmp.lt.u32.totalorder %s1543_s8, %s1787_s0  ;;  %p1275_p6 = scmp.lt.u32.totalorder %s1273_s17, %s1268_s12 }
  0x4b   : > { %p1271_p2 = pnand %p1270_p0, %p1269_p12  ;;  %p1277_p3 = scmp.lt.u32.totalorder %s1268_s12, %s1543_s8 }
  0x4c   : > { %p1276_p10 = por %p1275_p6, %p1274_p13 }
  0x4d   : > { %p1272_p1 = pneg %p1271_p2 }
  0x4e   : > { %p1278_p7 = por %p1277_p3, %p1276_p10 }
  0x50   : > { %p1279_p9 = pnand %p1278_p7, %p1272_p1 }
  0x52   : > { %1282 = shalt.err (!%p1279_p9)
}
  0x53   : > { %s1283_s30 = scalar_lea.vmem %s1545_s10, 2048  ;;  %s1374_s15 = smov [#allocation2]  }
  0x54   : > { %p1284_p12 = scmp.ne.s32.totalorder %s1545_s10, %s1283_s30  ;;  %s1288_s16 = sshll.u32 %s1374_s15, 4  ;;  %s1289_s16 = int_to_ptr.vmem [resolvable:$false] %s1288_s16 }
  0x55   : > { %s1290_s9 = scalar_lea.vmem %s1289_s16, 4096  ;;  %p1291_p4 = scmp.lt.s32.totalorder %s1545_s10, %s1289_s16 }
  0x56   : > { %p1286_p2 = pnand %p1284_p12, %p1270_p0  ;;  %p1292_p13 = scmp.lt.s32.totalorder %s1290_s9, %s1283_s30 }
  0x58   : > { %p1287_p5 = pneg %p1286_p2  ;;  %p1293_p6 = por %p1292_p13, %p1291_p4 }
  0x5a   : > { %p1294_p10 = pnand %p1293_p6, %p1287_p5 }
  0x5c   : > { %1297 = shalt.err (!%p1294_p10)
}
  0x5d   : > { %s1375_s12 = smov 128   ;;  %s1376_s13 = smov 8  }
  0x5e   : > { %1081 = dma.hbm_to_vmem [thread:$0]  (!%p1547_p11), %s1543_s8, 2048, %s1545_s10, %s1551_s28, %s1375_s12, %s1375_s12, %s1376_s13  }
  0x5f   : > { %231 = sbr.rel (%p1450_p8) target bundleno = 934 (0x3a6), region = 40  ;;  %s1582_s29 = sand.u32 (!%p1450_p8), 1, %s1360_s19  }
  0x60   : > { %s934_s17 = sshll.u32 (!%p1450_p8), %s1582_s29, 7  ;;  %s234_s7 = scalar_lea.sflag (!%p1450_p8), [#allocation3], %s1582_s29 }
  0x61   : > { %s1588_s6 = scalar_lea.vmem (!%p1450_p8), [#allocation2], %s934_s17  ;;  %p1803_p4 = scmp.ne.s32.totalorder (!%p1450_p8), %s1796_s24, 0 }
  0x66   : > { %1343 = dma.done.wait (%p1803_p4), %s234_s7, 2048  }
  0x67   : > { %1345 = vsyncadd (%p1803_p4), %s234_s7, 4294965248  ;;  %p1804_p5 = scmp.eq.s32.totalorder %s1431_s22, 0 }
  0x69   : > { %1347 = dma.done.wait (%p1804_p5), [#allocation6], 2048   ;;  %p1805_p8 = pmov %p1804_p5 }
  0x6a   : > { %v1132_v0 = vld [vmem:[#allocation5] sm:$0xff]   ;;  %v1133_v1 = vld [vmem:[#allocation5 + $0x8] sm:$0xff]   ;;  %v1134_v2 = vld [vmem:[#allocation5 + $0x10] sm:$0xff]   ;;  %s1703_s11 = scalar_lea.vmem [#allocation8], %s934_s17  ;;  %s962_s28 = sshll.u32 %s1431_s22, 11 }
  0x6b   : > { %1349 = vsyncadd (%p1805_p8), [#allocation6], 4294965248  ;;  %995 = vmatprep.subr.bf16.mxu0 %v1132_v0  ;;  %v1135_v3 = vld [vmem:[#allocation5 + $0x18] sm:$0xff]   ;;  %v275_v4 = vld [vmem:[%s1588_s6] sm:$0xff]  ;;  %s833_s30 = sshll.u32 %s1703_s11, 4  ;;  %s1739_s9 = scalar_lea.hbm %s1792_s5, %s962_s28  ;;  %s1741_s30 = int_to_ptr.vmem [resolvable:$true] %s833_s30 }
  0x6c   : > { %996 = vmatpush3.bf16.msra.mxu0 %v1132_v0  ;;  %v276_v5 = vld [vmem:[%s1588_s6 + $0x8] sm:$0xff]  ;;  %v1136_v7 = vld [vmem:[#allocation5 + $0x20] sm:$0xff]   ;;  %v1142_v11 = vld [vmem:[#allocation7 + $0x10] sm:$0xff]   ;;  %s820_s22 = scalar_lea.sflag [#allocation4], %s1582_s29  ;;  %s1298_s12 = scalar_lea.vmem %s1741_s30, 2048 }
  0x6d   : > { %997 = vmatprep.subr.bf16.mxu0 %v1133_v1  ;;  %v291_v6 = vpack.c.bf16 %v276_v5, %v275_v4  ;;  %v1140_v8 = vld [vmem:[#allocation7] sm:$0xff]   ;;  %v1141_v9 = vld [vmem:[#allocation7 + $0x8] sm:$0xff]   ;;  %v1138_v12 = vld [vmem:[#allocation5 + $0x30] sm:$0xff]   ;;  %p1299_p11 = scmp.ne.s32.totalorder %s1741_s30, %s1298_s12  ;;  %p1806_p0 = scmp.ne.s32.totalorder %s1801_s23, 0 }
  0x6e   : > { %v1137_v10 = vld [vmem:[#allocation5 + $0x28] sm:$0xff]   ;;  %1027 = vmatprep.subr.bf16.mxu1 %v1140_v8  ;;  %v1143_v13 = vld [vmem:[#allocation7 + $0x18] sm:$0xff]   ;;  %v1144_v15 = vld [vmem:[#allocation7 + $0x20] sm:$0xff]   ;;  %s1377_s13 = smov [#allocation8]  }
  0x6f   : > { %1011 = vmatprep.mubr.bf16.mxu0 %v291_v6  ;;  %1028 = vmatpush3.bf16.msra.mxu1 %v1140_v8  ;;  %v1139_v14 = vld [vmem:[#allocation5 + $0x38] sm:$0xff]   ;;  %v277_v16 = vld [vmem:[%s1588_s6 + $0x10] sm:$0xff]  ;;  %v279_v18 = vld [vmem:[%s1588_s6 + $0x20] sm:$0xff]  ;;  %p1300_p1 = pnand %p1299_p11, %p1806_p0  ;;  %s1302_s17 = sshll.u32 %s1377_s13, 4  ;;  %s1303_s17 = int_to_ptr.vmem [resolvable:$false] %s1302_s17 }
  0x70   : > { %998 = vmatpush3.bf16.msra.mxu0 %v1133_v1  ;;  %1029 = vmatprep.subr.bf16.mxu1 %v1141_v9  ;;  %v278_v17 = vld [vmem:[%s1588_s6 + $0x18] sm:$0xff]  ;;  %v280_v19 = vld [vmem:[%s1588_s6 + $0x28] sm:$0xff]  ;;  %v281_v23 = vld [vmem:[%s1588_s6 + $0x30] sm:$0xff]  ;;  %s1304_s7 = scalar_lea.vmem %s1303_s17, 4096  ;;  %p1305_p7 = scmp.lt.s32.totalorder %s1741_s30, %s1303_s17 }
  0x71   : > { %999 = vmatprep.subr.bf16.mxu0 %v1134_v2  ;;  %v292_v20 = vpack.c.bf16 %v278_v17, %v277_v16  ;;  %v1145_v21 = vld [vmem:[#allocation7 + $0x28] sm:$0xff]   ;;  %v293_v22 = vpack.c.bf16 %v280_v19, %v279_v18  ;;  %v282_v24 = vld [vmem:[%s1588_s6 + $0x38] sm:$0xff]  ;;  %v283_v25 = vld [vmem:[%s1588_s6 + $0x40] sm:$0xff]  ;;  %p1301_p3 = pneg %p1300_p1  ;;  %p1306_p9 = scmp.lt.s32.totalorder %s1304_s7, %s1298_s12 }
  0x72   : > { %v284_v26 = vld [vmem:[%s1588_s6 + $0x48] sm:$0xff]  ;;  %v294_v27 = vpack.c.bf16 %v282_v24, %v281_v23  ;;  %v285_v29 = vld [vmem:[%s1588_s6 + $0x50] sm:$0xff]  ;;  %v286_v30 = vld [vmem:[%s1588_s6 + $0x58] sm:$0xff] }
  0x73   : > { %1030 = vmatpush3.bf16.msra.mxu1 %v1141_v9  ;;  %v295_v28 = vpack.c.bf16 %v284_v26, %v283_v25  ;;  %v287_v31 = vld [vmem:[%s1588_s6 + $0x60] sm:$0xff]  ;;  %v288_v32 = vld [vmem:[%s1588_s6 + $0x68] sm:$0xff]  ;;  %v296_v33 = vpack.c.bf16 %v286_v30, %v285_v29  ;;  %v289_v35 = vld [vmem:[%s1588_s6 + $0x70] sm:$0xff]  ;;  %p1307_p12 = por %p1306_p9, %p1305_p7 }
  0x74   : > { %1000 = vmatpush3.bf16.msra.mxu0 %v1134_v2  ;;  %1031 = vmatprep.subr.bf16.mxu1 %v1142_v11  ;;  %v297_v34 = vpack.c.bf16 %v288_v32, %v287_v31  ;;  %v290_v36 = vld [vmem:[%s1588_s6 + $0x78] sm:$0xff]  ;;  %v1146_v38 = vld [vmem:[#allocation7 + $0x30] sm:$0xff]   ;;  %v938_v40 = vld [vmem:[%s1789_s2] ss:$0 sm:$0xff] }
  0x75   : > { %1001 = vmatprep.subr.bf16.mxu0 %v1135_v3  ;;  %v298_v37 = vpack.c.bf16 %v290_v36, %v289_v35  ;;  %v1147_v39 = vld [vmem:[#allocation7 + $0x38] sm:$0xff]   ;;  %p1308_p2 = pnand %p1307_p12, %p1301_p3 }
  0x77   : > { %1032 = vmatpush3.bf16.msra.mxu1 %v1142_v11 }
  0x78   : > { %1002 = vmatpush3.bf16.msra.mxu0 %v1135_v3  ;;  %1033 = vmatprep.subr.bf16.mxu1 %v1143_v13 }
  0x79   : > { %1003 = vmatprep.subr.bf16.mxu0 %v1136_v7 }
  0x7b   : > { %1034 = vmatpush3.bf16.msra.mxu1 %v1143_v13 }
  0x7c   : > { %1004 = vmatpush3.bf16.msra.mxu0 %v1136_v7  ;;  %1035 = vmatprep.subr.bf16.mxu1 %v1144_v15 }
  0x7d   : > { %1005 = vmatprep.subr.bf16.mxu0 %v1137_v10 }
  0x7f   : > { %1036 = vmatpush3.bf16.msra.mxu1 %v1144_v15 }
  0x80   : > { %1006 = vmatpush3.bf16.msra.mxu0 %v1137_v10  ;;  %1037 = vmatprep.subr.bf16.mxu1 %v1145_v21 }
  0x81   : > { %1007 = vmatprep.subr.bf16.mxu0 %v1138_v12 }
  0x83   : > { %1038 = vmatpush3.bf16.msra.mxu1 %v1145_v21 }
  0x84   : > { %1008 = vmatpush3.bf16.msra.mxu0 %v1138_v12  ;;  %1039 = vmatprep.subr.bf16.mxu1 %v1146_v38 }
  0x85   : > { %1009 = vmatprep.subr.bf16.mxu0 %v1139_v14 }
  0x87   : > { %1040 = vmatpush3.bf16.msra.mxu1 %v1146_v38 }
  0x88   : > { %1010 = vmatpush3.bf16.msra.mxu0 %v1139_v14  ;;  %1041 = vmatprep.subr.bf16.mxu1 %v1147_v39 }
  0x8b   : > { %1012 = vmatmul.mubr.bf16.vlgmr.msra.gmra.mrb[0].mxu0 %v292_v20  ;;  %1042 = vmatpush3.bf16.msra.mxu1 %v1147_v39 }
  0x8c   : > { %1015 = vmatprep.mubr.bf16.mxu0 %v293_v22 }
  0x93   : > { %1016 = vmatmul.mubr.bf16.gmra.mrb[4].mxu0 %v294_v27 }
  0x94   : > { %1019 = vmatprep.mubr.bf16.mxu0 %v295_v28 }
  0x9b   : > { %1020 = vmatmul.mubr.bf16.gmra.mrb[8].mxu0 %v296_v33  ;;  %v947_v33 = vld [vmem:[%s1791_s4] ss:$0 sm:$0xff] }
  0x9c   : > { %1023 = vmatprep.mubr.bf16.mxu0 %v297_v34 }
  0xa3   : > { %1024 = vmatmul.mubr.bf16.gmra.mrb[12].mxu0 %v298_v37 }
 0x15e   : > { %v1013_v41 = vpop.f32.mrb[0].mxu0 }
 0x15f   : > { %v413_v42 = vadd.f32 %v1013_v41, %v938_v40  ;;  %v404_v43 = vpop.f32.mrb[1].mxu0 }
 0x160   : > { %v405_v44 = vadd.f32 %v938_v40, %v404_v43  ;;  %v1014_v45 = vpop.f32.mrb[2].mxu0 }
 0x161   : > { %v416_v46 = vadd.f32 %v1014_v45, %v938_v40  ;;  %v407_v47 = vpop.f32.mrb[3].mxu0  ;;  %v469_v49 = vmax.f32 %v413_v42, 0.0 }
 0x162   : > { %v408_v48 = vadd.f32 %v938_v40, %v407_v47  ;;  %v467_v51 = vmax.f32 %v405_v44, 0.0 }
 0x163   : > { %v470_v50 = vmax.f32 %v416_v46, 0.0 }
 0x164   : > { %v468_v52 = vmax.f32 %v408_v48, 0.0 }
 0x165   : > { %v484_v53 = vpack.c.bf16 %v470_v50, %v469_v49 }
 0x166   : > { %v1017_v54 = vpop.f32.mrb[4].mxu0  ;;  %v483_v55 = vpack.c.bf16 %v468_v52, %v467_v51 }
 0x167   : > { %v429_v56 = vadd.f32 %v1017_v54, %v938_v40  ;;  %v420_v57 = vpop.f32.mrb[5].mxu0 }
 0x168   : > { %v421_v58 = vadd.f32 %v938_v40, %v420_v57  ;;  %v1018_v59 = vpop.f32.mrb[6].mxu0  ;;  %1043 = vmatprep.mubr.bf16.mxu1 %v483_v55 }
 0x169   : > { %v473_v60 = vmax.f32 %v429_v56, 0.0  ;;  %v432_v61 = vadd.f32 %v1018_v59, %v938_v40  ;;  %v423_v62 = vpop.f32.mrb[7].mxu0  ;;  %1044 = vmatmul.mubr.bf16.vlgmr.msra.gmra.mrb[0].mxu1 %v484_v53 }
 0x16a   : > { %v424_v63 = vadd.f32 %v938_v40, %v423_v62  ;;  %v471_v1 = vmax.f32 %v421_v58, 0.0 }
 0x16b   : > { %v474_v0 = vmax.f32 %v432_v61, 0.0 }
 0x16c   : > { %v472_v2 = vmax.f32 %v424_v63, 0.0 }
 0x16d   : > { %v486_v3 = vpack.c.bf16 %v474_v0, %v473_v60 }
 0x16e   : > { %v485_v4 = vpack.c.bf16 %v472_v2, %v471_v1  ;;  %v1021_v5 = vpop.f32.mrb[8].mxu0 }
 0x16f   : > { %v445_v6 = vadd.f32 %v1021_v5, %v938_v40  ;;  %v436_v7 = vpop.f32.mrb[9].mxu0 }
 0x170   : > { %v437_v8 = vadd.f32 %v938_v40, %v436_v7  ;;  %v1022_v9 = vpop.f32.mrb[10].mxu0  ;;  %1047 = vmatprep.mubr.bf16.mxu1 %v485_v4 }
 0x171   : > { %v477_v10 = vmax.f32 %v445_v6, 0.0  ;;  %v448_v11 = vadd.f32 %v1022_v9, %v938_v40  ;;  %v439_v12 = vpop.f32.mrb[11].mxu0  ;;  %1048 = vmatmul.mubr.bf16.gmra.mrb[4].mxu1 %v486_v3 }
 0x172   : > { %v440_v13 = vadd.f32 %v938_v40, %v439_v12  ;;  %v475_v15 = vmax.f32 %v437_v8, 0.0 }
 0x173   : > { %v478_v14 = vmax.f32 %v448_v11, 0.0 }
 0x174   : > { %v476_v16 = vmax.f32 %v440_v13, 0.0 }
 0x175   : > { %v488_v17 = vpack.c.bf16 %v478_v14, %v477_v10 }
 0x176   : > { %v487_v18 = vpack.c.bf16 %v476_v16, %v475_v15  ;;  %v1025_v19 = vpop.f32.mrb[12].mxu0 }
 0x177   : > { %v461_v20 = vadd.f32 %v1025_v19, %v938_v40  ;;  %v452_v21 = vpop.f32.mrb[13].mxu0 }
 0x178   : > { %v453_v22 = vadd.f32 %v938_v40, %v452_v21  ;;  %v1026_v23 = vpop.f32.mrb[14].mxu0  ;;  %1051 = vmatprep.mubr.bf16.mxu1 %v487_v18 }
 0x179   : > { %v481_v24 = vmax.f32 %v461_v20, 0.0  ;;  %v464_v25 = vadd.f32 %v1026_v23, %v938_v40  ;;  %v455_v26 = vpop.f32.mrb[15].mxu0  ;;  %1052 = vmatmul.mubr.bf16.gmra.mrb[8].mxu1 %v488_v17 }
 0x17a   : > { %v456_v27 = vadd.f32 %v938_v40, %v455_v26  ;;  %v479_v29 = vmax.f32 %v453_v22, 0.0 }
 0x17b   : > { %v482_v28 = vmax.f32 %v464_v25, 0.0 }
 0x17c   : > { %v480_v30 = vmax.f32 %v456_v27, 0.0 }
 0x17d   : > { %v490_v31 = vpack.c.bf16 %v482_v28, %v481_v24 }
 0x17e   : > { %v489_v32 = vpack.c.bf16 %v480_v30, %v479_v29 }
 0x180   : > { %1055 = vmatprep.mubr.bf16.mxu1 %v489_v32 }
 0x181   : > { %1056 = vmatmul.mubr.bf16.gmra.mrb[12].mxu1 %v490_v31 }
 0x23c   : > { %v1045_v34 = vpop.f32.mrb[0].mxu1 }
 0x23d   : > { %v605_v35 = vadd.f32 %v1045_v34, %v947_v33  ;;  %v596_v36 = vpop.f32.mrb[1].mxu1 }
 0x23e   : > { %v597_v37 = vadd.f32 %v947_v33, %v596_v36  ;;  %v1046_v38 = vpop.f32.mrb[2].mxu1 }
 0x23f   : > { %663 = vmax.xlane.f32.xlu1 %v605_v35  ;;  %v599_v39 = vpop.f32.mrb[3].mxu1  ;;  %v608_v40 = vadd.f32 %v1046_v38, %v947_v33 }
 0x240   : > { %659 = vmax.xlane.f32.xlu0 %v597_v37  ;;  %v600_v41 = vadd.f32 %v947_v33, %v599_v39 }
 0x243   : > { %665 = vmax.xlane.f32.xlu1 %v608_v40 }
 0x244   : > { %v1049_v42 = vpop.f32.mrb[4].mxu1  ;;  %661 = vmax.xlane.f32.xlu0 %v600_v41 }
 0x245   : > { %v621_v43 = vadd.f32 %v1049_v42, %v947_v33  ;;  %v612_v44 = vpop.f32.mrb[5].mxu1 }
 0x246   : > { %v1050_v45 = vpop.f32.mrb[6].mxu1  ;;  %v613_v48 = vadd.f32 %v947_v33, %v612_v44 }
 0x247   : > { %v624_v46 = vadd.f32 %v1050_v45, %v947_v33  ;;  %v615_v47 = vpop.f32.mrb[7].mxu1 }
 0x248   : > { %671 = vmax.xlane.f32.xlu0 %v621_v43  ;;  %v616_v49 = vadd.f32 %v947_v33, %v615_v47 }
 0x249   : > { %673 = vmax.xlane.f32.xlu1 %v624_v46 }
 0x24c   : > { %v1053_v50 = vpop.f32.mrb[8].mxu1  ;;  %667 = vmax.xlane.f32.xlu0 %v613_v48 }
 0x24d   : > { %v1620_v51 = vadd.f32 %v1053_v50, %v947_v33  ;;  %v628_v52 = vpop.f32.mrb[9].mxu1  ;;  %669 = vmax.xlane.f32.xlu1 %v616_v49 }
 0x24e   : > { %v1054_v53 = vpop.f32.mrb[10].mxu1  ;;  %v1626_v56 = vadd.f32 %v947_v33, %v628_v52 }
 0x24f   : > { %v1622_v54 = vadd.f32 %v1054_v53, %v947_v33  ;;  %v631_v55 = vpop.f32.mrb[11].mxu1 }
 0x250   : > { %679 = vmax.xlane.f32.xlu0 %v1620_v51  ;;  %v1628_v57 = vadd.f32 %v947_v33, %v631_v55 }
 0x251   : > { %681 = vmax.xlane.f32.xlu1 %v1622_v54 }
 0x254   : > { %v1057_v58 = vpop.f32.mrb[12].mxu1  ;;  %675 = vmax.xlane.f32.xlu0 %v1626_v56 }
 0x255   : > { %v644_v59 = vpop.f32.mrb[13].mxu1  ;;  %677 = vmax.xlane.f32.xlu1 %v1628_v57  ;;  %v1637_v0 = vadd.f32 %v1057_v58, %v947_v33 }
 0x256   : > { %v1632_v60 = vadd.f32 %v947_v33, %v644_v59  ;;  %v1058_v61 = vpop.f32.mrb[14].mxu1 }
 0x257   : > { %v647_v62 = vpop.f32.mrb[15].mxu1  ;;  %v1640_v1 = vadd.f32 %v1058_v61, %v947_v33 }
 0x258   : > { %v1634_v63 = vadd.f32 %v947_v33, %v647_v62  ;;  %683 = vmax.xlane.f32.xlu0 %v1632_v60 }
 0x25a   : > { %685 = vmax.xlane.f32.xlu1 %v1634_v63 }
 0x25c   : > { %687 = vmax.xlane.f32.xlu0 %v1637_v0 }
 0x25e   : > { %689 = vmax.xlane.f32.xlu1 %v1640_v1 }
 0x2cc   : > { %v664_v2 = vpop.xlane.xlu1 %663 }
 0x2cd   : > { %v693_v3 = vsub.f32 %v605_v35, %v664_v2  ;;  %v660_v4 = vpop.xlane.xlu0 %659 }
 0x2ce   : > { %v691_v5 = vsub.f32 %v597_v37, %v660_v4 }
 0x2cf   : > { %v711_v6 = vmul.f32 1.442695, %v693_v3 }
 0x2d0   : > { %v707_v7 = vmul.f32 1.442695, %v691_v5  ;;  %v666_v8 = vpop.xlane.xlu1 %665 }
 0x2d1   : > { %1148 = vpow2.f32 %v711_v6  ;;  %v694_v9 = vsub.f32 %v608_v40, %v666_v8  ;;  %v662_v10 = vpop.xlane.xlu0 %661 }
 0x2d2   : > { %v692_v11 = vsub.f32 %v600_v41, %v662_v10  ;;  %1150 = vpow2.f32 %v707_v7 }
 0x2d3   : > { %v713_v12 = vmul.f32 1.442695, %v694_v9 }
 0x2d4   : > { %v709_v13 = vmul.f32 1.442695, %v692_v11 }
 0x2d5   : > { %1152 = vpow2.f32 %v713_v12  ;;  %v672_v14 = vpop.xlane.xlu0 %671 }
 0x2d6   : > { %v697_v15 = vsub.f32 %v621_v43, %v672_v14  ;;  %v674_v16 = vpop.xlane.xlu1 %673  ;;  %1154 = vpow2.f32 %v709_v13 }
 0x2d7   : > { %v698_v17 = vsub.f32 %v624_v46, %v674_v16 }
 0x2d8   : > { %v719_v18 = vmul.f32 1.442695, %v697_v15 }
 0x2d9   : > { %v721_v19 = vmul.f32 1.442695, %v698_v17  ;;  %v668_v20 = vpop.xlane.xlu0 %667 }
 0x2da   : > { %1156 = vpow2.f32 %v719_v18  ;;  %v695_v21 = vsub.f32 %v613_v48, %v668_v20  ;;  %v670_v22 = vpop.xlane.xlu1 %669 }
 0x2db   : > { %v1644_v23 = vpop.eup %1148  ;;  %v696_v24 = vsub.f32 %v616_v49, %v670_v22  ;;  %1158 = vpow2.f32 %v721_v19 }
 0x2dc   : > { %v715_v25 = vmul.f32 1.442695, %v695_v21  ;;  %743 = vadd.xlane.f32.xlu0 %v1644_v23  ;;  %v1647_v28 = vpop.eup %1150 }
 0x2dd   : > { %v717_v26 = vmul.f32 1.442695, %v696_v24  ;;  %v680_v27 = vpop.xlane.xlu0 %679 }
 0x2de   : > { %1160 = vpow2.f32 %v715_v25  ;;  %v701_v29 = vsub.f32 %v1620_v51, %v680_v27  ;;  %v682_v30 = vpop.xlane.xlu1 %681 }
 0x2df   : > { %v1650_v31 = vpop.eup %1152  ;;  %v702_v32 = vsub.f32 %v1622_v54, %v682_v30  ;;  %1162 = vpow2.f32 %v717_v26 }
 0x2e0   : > { %v727_v33 = vmul.f32 1.442695, %v701_v29  ;;  %745 = vadd.xlane.f32.xlu1 %v1650_v31  ;;  %739 = vadd.xlane.f32.xlu0 %v1647_v28  ;;  %v1656_v38 = vpop.eup %1154 }
 0x2e1   : > { %v729_v34 = vmul.f32 1.442695, %v702_v32  ;;  %v676_v35 = vpop.xlane.xlu0 %675 }
 0x2e2   : > { %1164 = vpow2.f32 %v727_v33  ;;  %v699_v36 = vsub.f32 %v1626_v56, %v676_v35  ;;  %v678_v37 = vpop.xlane.xlu1 %677 }
 0x2e3   : > { %v700_v39 = vsub.f32 %v1628_v57, %v678_v37  ;;  %1166 = vpow2.f32 %v729_v34 }
 0x2e4   : > { %v1659_v40 = vpop.eup %1156  ;;  %v723_v41 = vmul.f32 1.442695, %v699_v36  ;;  %741 = vadd.xlane.f32.xlu1 %v1656_v38 }
 0x2e5   : > { %v725_v42 = vmul.f32 1.442695, %v700_v39  ;;  %751 = vadd.xlane.f32.xlu0 %v1659_v40  ;;  %v684_v43 = vpop.xlane.xlu0 %683  ;;  %v1664_v45 = vpop.eup %1158 }
 0x2e6   : > { %1168 = vpow2.f32 %v723_v41  ;;  %v703_v44 = vsub.f32 %v1632_v60, %v684_v43 }
 0x2e7   : > { %v686_v46 = vpop.xlane.xlu1 %685  ;;  %1170 = vpow2.f32 %v725_v42 }
 0x2e8   : > { %v1666_v47 = vpop.eup %1160  ;;  %v731_v48 = vmul.f32 1.442695, %v703_v44  ;;  %v704_v49 = vsub.f32 %v1634_v63, %v686_v46  ;;  %753 = vadd.xlane.f32.xlu1 %v1664_v45 }
 0x2e9   : > { %747 = vadd.xlane.f32.xlu0 %v1666_v47  ;;  %v688_v50 = vpop.xlane.xlu0 %687  ;;  %v1672_v53 = vpop.eup %1162 }
 0x2ea   : > { %1172 = vpow2.f32 %v731_v48  ;;  %v733_v51 = vmul.f32 1.442695, %v704_v49  ;;  %v705_v52 = vsub.f32 %v1637_v0, %v688_v50 }
 0x2eb   : > { %v690_v54 = vpop.xlane.xlu1 %689 }
 0x2ec   : > { %v1674_v55 = vpop.eup %1164  ;;  %1174 = vpow2.f32 %v733_v51  ;;  %v735_v56 = vmul.f32 1.442695, %v705_v52  ;;  %v706_v57 = vsub.f32 %v1640_v1, %v690_v54  ;;  %749 = vadd.xlane.f32.xlu1 %v1672_v53 }
 0x2ed   : > { %759 = vadd.xlane.f32.xlu0 %v1674_v55  ;;  %v1679_v59 = vpop.eup %1166 }
 0x2ee   : > { %1176 = vpow2.f32 %v735_v56  ;;  %v737_v58 = vmul.f32 1.442695, %v706_v57 }
 0x2f0   : > { %v1681_v60 = vpop.eup %1168  ;;  %1178 = vpow2.f32 %v737_v58  ;;  %761 = vadd.xlane.f32.xlu1 %v1679_v59 }
 0x2f1   : > { %755 = vadd.xlane.f32.xlu0 %v1681_v60  ;;  %v1685_v61 = vpop.eup %1170 }
 0x2f4   : > { %v1687_v62 = vpop.eup %1172  ;;  %757 = vadd.xlane.f32.xlu1 %v1685_v61 }
 0x2f5   : > { %763 = vadd.xlane.f32.xlu0 %v1687_v62 }
 0x2f6   : > { %v1691_v63 = vpop.eup %1174 }
 0x2f8   : > { %v1693_v0 = vpop.eup %1176  ;;  %765 = vadd.xlane.f32.xlu1 %v1691_v63 }
 0x2f9   : > { %767 = vadd.xlane.f32.xlu0 %v1693_v0 }
 0x2fa   : > { %v1697_v1 = vpop.eup %1178 }
 0x2fc   : > { %769 = vadd.xlane.f32.xlu1 %v1697_v1 }
 0x369   : > { %v744_v2 = vpop.xlane.xlu0 %743 }
 0x36a   : > { %1180 = vrcp.f32 %v744_v2 }
 0x36d   : > { %v746_v3 = vpop.xlane.xlu1 %745  ;;  %v740_v4 = vpop.xlane.xlu0 %739 }
 0x36e   : > { %1182 = vrcp.f32 %v746_v3 }
 0x36f   : > { %1184 = vrcp.f32 %v740_v4 }
 0x371   : > { %v742_v5 = vpop.xlane.xlu1 %741 }
 0x372   : > { %1186 = vrcp.f32 %v742_v5  ;;  %v752_v6 = vpop.xlane.xlu0 %751 }
 0x373   : > { %1188 = vrcp.f32 %v752_v6 }
 0x374   : > { %v1181_v7 = vpop.eup %1180 }
 0x375   : > { %v776_v8 = vmul.f32 %v1181_v7, %v1644_v23  ;;  %v754_v9 = vpop.xlane.xlu1 %753 }
 0x376   : > { %1190 = vrcp.f32 %v754_v9  ;;  %v748_v10 = vpop.xlane.xlu0 %747 }
 0x377   : > { %805 = vst [vmem:[%s1703_s11 + $0x10] sm:$0xff] %v776_v8  ;;  %1192 = vrcp.f32 %v748_v10 }
 0x378   : > { %v1183_v11 = vpop.eup %1182 }
 0x379   : > { %v1185_v12 = vpop.eup %1184  ;;  %v778_v13 = vmul.f32 %v1183_v11, %v1650_v31  ;;  %v750_v14 = vpop.xlane.xlu1 %749 }
 0x37a   : > { %v772_v15 = vmul.f32 %v1185_v12, %v1647_v28  ;;  %1194 = vrcp.f32 %v750_v14  ;;  %v760_v16 = vpop.xlane.xlu0 %759 }
 0x37b   : > { %806 = vst [vmem:[%s1703_s11 + $0x18] sm:$0xff] %v778_v13  ;;  %1196 = vrcp.f32 %v760_v16 }
 0x37c   : > { %v1187_v17 = vpop.eup %1186  ;;  %803 = vst [vmem:[%s1703_s11] sm:$0xff] %v772_v15 }
 0x37d   : > { %v1189_v18 = vpop.eup %1188  ;;  %v774_v19 = vmul.f32 %v1187_v17, %v1656_v38  ;;  %v762_v20 = vpop.xlane.xlu1 %761 }
 0x37e   : > { %v784_v21 = vmul.f32 %v1189_v18, %v1659_v40  ;;  %1198 = vrcp.f32 %v762_v20  ;;  %v756_v22 = vpop.xlane.xlu0 %755 }
 0x37f   : > { %804 = vst [vmem:[%s1703_s11 + $0x8] sm:$0xff] %v774_v19  ;;  %1200 = vrcp.f32 %v756_v22 }
 0x380   : > { %v1191_v23 = vpop.eup %1190  ;;  %809 = vst [vmem:[%s1703_s11 + $0x30] sm:$0xff] %v784_v21 }
 0x381   : > { %v1193_v24 = vpop.eup %1192  ;;  %v786_v25 = vmul.f32 %v1191_v23, %v1664_v45  ;;  %v758_v26 = vpop.xlane.xlu1 %757 }
 0x382   : > { %v780_v27 = vmul.f32 %v1193_v24, %v1666_v47  ;;  %1202 = vrcp.f32 %v758_v26  ;;  %v764_v28 = vpop.xlane.xlu0 %763 }
 0x383   : > { %810 = vst [vmem:[%s1703_s11 + $0x38] sm:$0xff] %v786_v25  ;;  %1204 = vrcp.f32 %v764_v28 }
 0x384   : > { %v1195_v29 = vpop.eup %1194  ;;  %807 = vst [vmem:[%s1703_s11 + $0x20] sm:$0xff] %v780_v27 }
 0x385   : > { %v1197_v30 = vpop.eup %1196  ;;  %v782_v31 = vmul.f32 %v1195_v29, %v1672_v53  ;;  %v766_v32 = vpop.xlane.xlu1 %765 }
 0x386   : > { %v792_v33 = vmul.f32 %v1197_v30, %v1674_v55  ;;  %1206 = vrcp.f32 %v766_v32  ;;  %v768_v34 = vpop.xlane.xlu0 %767 }
 0x387   : > { %808 = vst [vmem:[%s1703_s11 + $0x28] sm:$0xff] %v782_v31  ;;  %1208 = vrcp.f32 %v768_v34 }
 0x388   : > { %v1199_v35 = vpop.eup %1198  ;;  %813 = vst [vmem:[%s1703_s11 + $0x50] sm:$0xff] %v792_v33 }
 0x389   : > { %v1201_v36 = vpop.eup %1200  ;;  %v794_v37 = vmul.f32 %v1199_v35, %v1679_v59  ;;  %v770_v38 = vpop.xlane.xlu1 %769 }
 0x38a   : > { %v788_v39 = vmul.f32 %v1201_v36, %v1681_v60  ;;  %1210 = vrcp.f32 %v770_v38 }
 0x38b   : > { %814 = vst [vmem:[%s1703_s11 + $0x58] sm:$0xff] %v794_v37 }
 0x38c   : > { %v1203_v40 = vpop.eup %1202  ;;  %811 = vst [vmem:[%s1703_s11 + $0x40] sm:$0xff] %v788_v39 }
 0x38d   : > { %v1205_v41 = vpop.eup %1204  ;;  %v790_v42 = vmul.f32 %v1203_v40, %v1685_v61 }
 0x38e   : > { %v796_v43 = vmul.f32 %v1205_v41, %v1687_v62 }
 0x38f   : > { %812 = vst [vmem:[%s1703_s11 + $0x48] sm:$0xff] %v790_v42 }
 0x390   : > { %v1207_v44 = vpop.eup %1206  ;;  %815 = vst [vmem:[%s1703_s11 + $0x60] sm:$0xff] %v796_v43 }
 0x391   : > { %v1209_v45 = vpop.eup %1208  ;;  %v798_v46 = vmul.f32 %v1207_v44, %v1691_v63 }
 0x392   : > { %v800_v47 = vmul.f32 %v1209_v45, %v1693_v0 }
 0x393   : > { %816 = vst [vmem:[%s1703_s11 + $0x68] sm:$0xff] %v798_v46 }
 0x394   : > { %v1211_v48 = vpop.eup %1210  ;;  %817 = vst [vmem:[%s1703_s11 + $0x70] sm:$0xff] %v800_v47 }
 0x395   : > { %v802_v49 = vmul.f32 %v1211_v48, %v1697_v1 }
 0x397   : > { %818 = vst [vmem:[%s1703_s11 + $0x78] sm:$0xff] %v802_v49 }
 0x398   : > { %1311 = shalt.err (!%p1308_p2)
}
 0x399   : > { %s1312_s6 = scalar_lea.hbm %s1739_s9, 2048  ;;  %s1316_s8 = scalar_lea.hbm %s1792_s5, 4096 }
 0x39a   : > { %p1313_p13 = scmp.ne.s32.totalorder %s1739_s9, %s1312_s6  ;;  %p1317_p4 = scmp.lt.u32.totalorder %s1739_s9, %s1792_s5 }
 0x39b   : > { %p1318_p5 = scmp.lt.u32.totalorder %s1316_s8, %s1312_s6  ;;  %p1320_p11 = scmp.lt.u32.totalorder %s1312_s6, %s1739_s9 }
 0x39c   : > { %p1314_p6 = pnand %p1313_p13, %p1806_p0 }
 0x39d   : > { %p1319_p8 = por %p1318_p5, %p1317_p4 }
 0x39e   : > { %p1315_p10 = pneg %p1314_p6 }
 0x39f   : > { %p1321_p1 = por %p1320_p11, %p1319_p8 }
 0x3a1   : > { %p1322_p3 = pnand %p1321_p1, %p1315_p10 }
 0x3a3   : > { %1325 = shalt.err (!%p1322_p3)
}
 0x3a4   : > { %s1378_s28 = smov 128   ;;  %s1379_s15 = smov 8  }
 0x3a5   : > { %1069 = dma.vmem_to_hbm [thread:$0]  (%p1806_p0), %s1741_s30, 2048, %s1739_s9, %s820_s22, %s1378_s28, %s1378_s28, %s1379_s15  }
 0x3a6 PF: > { %s848_s16 = sand.u32 1, %s1356_s18   ;;  %p1807_p7 = scmp.ne.s32.totalorder %s1797_s25, 0 }
 0x3a7   : > { %p1808_p9 = scmp.ge.s32.totalorder %s1368_s21, 2  ;;  %s849_s12 = scalar_lea.sflag [#allocation4], %s848_s16 }
 0x3a9   : > { %p1083_p12 = pnand %p1808_p9, %p1807_p7 }
 0x3ab   : > { %1351 = dma.done.wait (!%p1083_p12), %s849_s12, 2048  }
 0x3ac   : > { %1353 = vsyncadd (!%p1083_p12), %s849_s12, 4294965248  ;;  %p19_p2 = scmp.ge.s32.totalorder %s1520_s14, 4   ;;  %s1809_s18 = smov %s1360_s19 }
 0x3ad   : > { %s1810_s19 = smov %s1364_s20  ;;  %s1811_s20 = smov %s1536_s27 }
 0x3ae   : > { %s1812_s21 = smov %s1520_s14  ;;  %21 = sbr.rel (!%p19_p2) target bundleno = 6 (0x6), region = 93 }
 0x3b5   :  { %854 = vsyncpa [#allocation3], 1 }
 0x3b6   :  { %856 = vsyncpa [#allocation3 + $0x1], 1 }
 0x3b7   :  { %857 = vsyncpa [#allocation6], 1 }
 0x3b8   :  { %858 = vsyncpa [#allocation4], 1 }
 0x3b9   :  { %860 = vsyncpa [#allocation4 + $0x1], 1 }

</bundles_post_ra>
